<compile_context>
chip_gen: v6e
topology: v6e:2x2x1
jax: 0.10.0
libtpu: 0.0.40
codegen_flags: <defaults>
</compile_context>

<pallas_src>
import jax
import jax.numpy as jnp
from jax.experimental import pallas as pl
from jax.experimental.pallas import tpu as pltpu


def _round_up(x, m):
    return ((x + m - 1) // m) * m


def _vmem_capacity_bytes():
    # Per-generation VMEM (v5e/v6e: 128 MiB, v7x: 64 MiB per TC); conservative fallback.
    try:
        cap = int(getattr(pltpu.get_tpu_info(), "vmem_capacity_bytes", 0))
        if cap > 0:
            return cap
    except Exception:
        pass
    return 64 * 1024 * 1024


def dummy_gpt_kernel(x_ref, w_ref, out_ref):
    # x_ref:   [TILE_M, E]      bf16  (tok+pos embeddings; dropout/blocks/norm are identity)
    # w_ref:   [E, TILE_V]      bf16  (out_head weight, pre-transposed; resident across M)
    # out_ref: [TILE_M, TILE_V]       (logits tile)
    # out_head: Linear(E, V, bias=False) -> x @ W.T, f32 accumulation on the MXU.
    out_ref[...] = jnp.dot(
        x_ref[...], w_ref[...], preferred_element_type=jnp.float32
    ).astype(out_ref.dtype)


def make_dummy_gpt_forward(tok_emb_table, pos_emb_table, w_out, *,
                           tile_m=256, tile_v=None, out_dtype=jnp.float32):
    """One-time setup for DummyGPTModel.forward.

    tok_emb_table: f32 [V, E]
    pos_emb_table: f32 [context_length, E]
    w_out:         f32 [V, E]   (PyTorch nn.Linear weight layout)
    Returns forward(in_idx: int32 [B, S]) -> logits [B, S, V] in out_dtype.
    """
    V, E = tok_emb_table.shape
    assert w_out.shape == (V, E)
    ctx_len = pos_emb_table.shape[0]

    out_bytes = jnp.dtype(out_dtype).itemsize
    vmem_cap = _vmem_capacity_bytes()

    # ---- tile sizing (generation-aware) ------------------------------------
    tile_m = _round_up(tile_m, 16)                 # bf16 packs 2 rows per sublane
    V_lane = _round_up(V, 128)                     # lane-dense vocab (unmasked vst)
    if tile_v is None:
        budget = int(0.70 * vmem_cap)              # headroom for compiler scratch
        per_col = 2 * E * 2 + 2 * tile_m * out_bytes   # dbuf weight col + dbuf out col
        fixed = 2 * tile_m * E * 2                     # dbuf x tile
        tile_v = max(128, ((budget - fixed) // max(per_col, 1)) // 128 * 128)
    TILE_V = min(_round_up(tile_v, 128), V_lane)
    V_pad = _round_up(V_lane, TILE_V)

    # ---- one-time weight prep (hoisted out of the per-call path) -----------
    # nn.Linear weight is [V, E]; logits = x @ W.T -> pre-transpose to [E, V_pad],
    # lane-dense padded, bf16 (MXU-native); accumulation stays f32 in-kernel.
    w_t = jnp.pad(w_out, ((0, V_pad - V), (0, 0))).T.astype(jnp.bfloat16)
    w_t = jax.block_until_ready(w_t)

    def forward(in_idx):
        B, S = in_idx.shape
        assert S <= ctx_len
        M = B * S
        TILE_M = min(tile_m, _round_up(M, 16))
        M_pad = _round_up(M, TILE_M)

        # ---- XLA glue: token gather + positional add (f32 add, bf16 cast) ----
        # TODO(synk): in-kernel token gather (scalar-prefetched ids + per-row DMA)
        # not implemented; the gather/add/cast/pad fuse into one XLA producer of x.
        tok_embeds = jnp.take(tok_emb_table, in_idx, axis=0)          # [B, S, E] f32
        pos_embeds = pos_emb_table[:S, :]                             # [S, E]    f32
        x = (tok_embeds + pos_embeds[None]).astype(jnp.bfloat16)      # [B, S, E] bf16
        x = jnp.pad(x.reshape(M, E), ((0, M_pad - M), (0, 0)))        # [M_pad, E]

        # Grid (V outer, M inner): the weight block index ignores the inner M axis,
        # so the (E, TILE_V) tile stays resident in VMEM across all row tiles.
        grid = (V_pad // TILE_V, M_pad // TILE_M)

        vmem_need = (
            2 * TILE_M * E * 2                   # x tile (bf16, double-buffered)
            + 2 * E * TILE_V * 2                 # weight tile (bf16, dbuf; resident)
            + 2 * TILE_M * TILE_V * out_bytes    # logits tile (double-buffered)
        )
        vmem_limit = int(min(0.85 * vmem_cap,
                             max(32 * 1024 * 1024, 2 * vmem_need)))

        out = pl.pallas_call(
            dummy_gpt_kernel,
            out_shape=jax.ShapeDtypeStruct((M_pad, V_pad), out_dtype),
            grid_spec=pltpu.PrefetchScalarGridSpec(
                num_scalar_prefetch=0,
                grid=grid,
                in_specs=[
                    # activations: streamed along the inner M axis
                    pl.BlockSpec((TILE_M, E), lambda v, m: (m, 0)),
                    # out_head weight: index constant across inner M -> resident;
                    # re-DMA'd only when the vocab tile v changes.
                    pl.BlockSpec((E, TILE_V), lambda v, m: (0, v)),
                ],
                out_specs=pl.BlockSpec((TILE_M, TILE_V), lambda v, m: (m, v)),
            ),
            compiler_params=pltpu.CompilerParams(
                # No cross-step state: both axes independent and megacore-shardable
                # (v7x's 2 TensorCores get work even when B == 1).
                dimension_semantics=("parallel", "parallel"),
                vmem_limit_bytes=vmem_limit,
            ),
        )(x, w_t)

        # TODO(synk): training-mode dropout (drop_emb) not implemented (eval identity).
        return out[:M, :V].reshape(B, S, V)

    return jax.jit(forward)


if __name__ == "__main__":
    # Small GPT config consistent with the module's __init__
    cfg = {
        "vocab_size": 128,
        "context_length": 16,
        "emb_dim": 32,
        "n_heads": 2,
        "n_layers": 2,
        "drop_rate": 0.1,
        "qkv_bias": False,
    }
    B, S = 2, 8  # batch_size, seq_len (seq_len <= context_length)

    key = jax.random.PRNGKey(0)
    k_tok, k_pos, k_out, k_idx = jax.random.split(key, 4)

    tok_emb_table = jax.random.normal(
        k_tok, (cfg["vocab_size"], cfg["emb_dim"]), dtype=jnp.float32) * 0.02
    pos_emb_table = jax.random.normal(
        k_pos, (cfg["context_length"], cfg["emb_dim"]), dtype=jnp.float32) * 0.02
    # nn.Linear(emb_dim, vocab_size, bias=False): weight shape [V, E]
    w_out = jax.random.normal(
        k_out, (cfg["vocab_size"], cfg["emb_dim"]), dtype=jnp.float32) * 0.02
    in_idx = jax.random.randint(k_idx, (B, S), 0, cfg["vocab_size"], dtype=jnp.int32)

    forward = make_dummy_gpt_forward(tok_emb_table, pos_emb_table, w_out)
    logits = forward(in_idx)
    jax.block_until_ready(logits)

    # Pure-JAX f32 reference of the same forward pass; the kernel runs the matmul with
    # bf16 inputs and f32 accumulation, so compare with a bf16-appropriate tolerance.
    x_ref = jnp.take(tok_emb_table, in_idx, axis=0) + pos_emb_table[:S][None]
    ref = jnp.einsum("bse,ve->bsv", x_ref, w_out)
    assert logits.shape == (B, S, cfg["vocab_size"])
    assert jnp.allclose(logits, ref, atol=2e-3, rtol=2e-2), \
        float(jnp.max(jnp.abs(logits - ref)))

    print("KERNEL_OK")
</pallas_src>

<mosaic_0001>
module attributes {stable_mosaic.version = 11 : i64} {
  func.func @dummy_gpt_kernel(%arg0: i32, %arg1: i32, %arg2: memref<16x32xbf16, #tpu.memory_space<vmem>>, %arg3: memref<32x128xbf16, #tpu.memory_space<vmem>>, %arg4: memref<16x128xf32, #tpu.memory_space<vmem>>) attributes {dimension_semantics = [#tpu.dimension_semantics<parallel>, #tpu.dimension_semantics<parallel>], iteration_bounds = array<i64: 1, 1>, scalar_prefetch = 0 : i64, scratch_operands = 0 : i64, tpu.core_type = #tpu.core_type<tc>, window_params = [{transform_indices = @transform_0, window_bounds = array<i64: 16, 32>}, {transform_indices = @transform_1, window_bounds = array<i64: 32, 128>}, {transform_indices = @transform_2, window_bounds = array<i64: 16, 128>}]} {
    %c0 = arith.constant 0 : index
    %c0_0 = arith.constant 0 : index
    %0 = vector.load %arg2[%c0, %c0_0] : memref<16x32xbf16, #tpu.memory_space<vmem>>, vector<16x32xbf16>
    %c0_1 = arith.constant 0 : index
    %c0_2 = arith.constant 0 : index
    %1 = vector.load %arg3[%c0_1, %c0_2] : memref<32x128xbf16, #tpu.memory_space<vmem>>, vector<32x128xbf16>
    %cst = arith.constant dense<0.000000e+00> : vector<16x128xf32>
    %2 = tpu.matmul %0, %1, %cst {dimension_numbers = #tpu.dot_dimension_numbers<[1], [0], [0], [1], [0, 0, 1, 1], [], []>} : vector<16x32xbf16>, vector<32x128xbf16>, vector<16x128xf32> -> vector<16x128xf32>
    %c0_3 = arith.constant 0 : index
    %c0_4 = arith.constant 0 : index
    %3 = vector.load %arg4[%c0_3, %c0_4] : memref<16x128xf32, #tpu.memory_space<vmem>>, vector<16x128xf32>
    tpu.vector_store %arg4[%c0_3, %c0_4], %2 {strides = array<i32>} : memref<16x128xf32, #tpu.memory_space<vmem>>, vector<16x128xf32>,
    return
  }
  func.func @transform_0(%arg0: i32, %arg1: i32) -> (i32, i32) {
    %c0_i32 = arith.constant 0 : i32
    %c0_i32_0 = arith.constant 0 : i32
    return %arg1, %c0_i32 : i32, i32
  }
  func.func @transform_1(%arg0: i32, %arg1: i32) -> (i32, i32) {
    %c0_i32 = arith.constant 0 : i32
    %c0_i32_0 = arith.constant 0 : i32
    return %c0_i32, %arg0 : i32, i32
  }
  func.func @transform_2(%arg0: i32, %arg1: i32) -> (i32, i32) {
    %c0_i32 = arith.constant 0 : i32
    return %arg1, %arg0 : i32, i32
  }
}

</mosaic_0001>

<bundles_post_ra>
// kernel: forward.1
= control target key start
LH: loop header
LB: loop body
LE: loop exit
PB: predicated region body
PF: predicated region fallthrough
CT: control target
= control target key end

     0   :  { %v144_v1 = vmov 0.0   ;;  %vm145_vm0 = vmmov 0   ;;  %s176_s0 = inlined_call_operand.vmem [shape: bf16[16,32], index: 0, kind: input, shape index: {}]   ;;  %s177_s1 = inlined_call_operand.vmem [shape: bf16[32,128], index: 1, kind: input, shape index: {}]   ;;  %s178_s2 = inlined_call_operand.hbm [shape: f32[16,128], index: 2, kind: output, shape index: {}]  }
   0x1   :  { %v119_v0 = vld [vmem:[%s177_s1 + $0x8] sm:$0xff]   ;;  %106 = vmatprep.subr.bf16.mxu0 %v144_v1  ;;  %v120_v2 = vld [vmem:[%s177_s1] sm:$0xff]   ;;  %110 = vmatprep.mubr.msk.bf16.mxu0 %vm145_vm0, %v144_v1 }
   0x2   :  { %107 = vmatpush3.bf16.msra.mxu0 %v119_v0 }
   0x3   :  { %108 = vmatprep.subr.bf16.mxu0 %v144_v1 }
   0x4   :  { %7 = vsyncpa [#allocation3], 0  ;;  %v121_v3 = vld [vmem:[%s176_s0] sm:$0xff]   ;;  %vm36_vm1 = vcmask 261120   ;;  %s146_s15 = smov [#allocation2]  }
   0x5   :  { %s88_s16 = sshll.u32 %s146_s15, 4  ;;  %s89_s16 = int_to_ptr.vmem [resolvable:$true] %s88_s16 }
   0x6   :  { %109 = vmatpush3.bf16.msra.mxu0 %v120_v2  ;;  %s122_s1 = scalar_lea.vmem %s89_s16, 256  ;;  %p127_p1 = scmp.lt.s32.totalorder %s89_s16, %s89_s16 }
   0x7   :  { %p123_p0 = scmp.ne.s32.totalorder %s89_s16, %s122_s1  ;;  %p128_p2 = scmp.lt.s32.totalorder %s122_s1, %s122_s1 }
   0x9   :  { %111 = vmatmul.mubr.msk.bf16.vlgmr.msra.gmra.mxu0 %vm36_vm1, %v121_v3  ;;  %p129_p3 = por %p128_p2, %p127_p1 }
   0xb   :  { %p130_p4 = pnand %p129_p3, %p123_p0 }
  0xc9   :  { %v74_v4 = vpop.f32.mrf.mxu0 }
  0xca   :  { %81 = vst [vmem:[#allocation2] sm:$0xff] %v74_v4 }
  0xcb   :  { %v112_v5 = vpop.f32.mrf.mxu0 }
  0xcd   :  { %v77_v6 = vpop.f32.mrf.mxu0 }
  0xce   :  { %82 = vst [vmem:[#allocation2 + $0x8] sm:$0xff] %v77_v6 }
  0xcf   :  { %v113_v7 = vpop.f32.mrf.mxu0 }
  0xd0   :  { %133 = shalt.err (!%p130_p4)
}
  0xd1   :  { %s147_s0 = smov 128   ;;  %s148_s17 = smov 8  }
  0xd2   :  { %94 = dma.vmem_to_hbm [thread:$0]  %s89_s16, 256, %s178_s2, [#allocation3], %s147_s0, %s147_s0, %s148_s17  }
  0xd3   :  { %142 = dma.done.wait [#allocation3], 256  }
  0xd4   :  { %143 = vsyncadd [#allocation3], 4294967040 }
  0xd5   :  { %98 = vsyncpa [#allocation3], 1 }

</bundles_post_ra>
